<compile_context>
chip_gen: v6e
topology: v6e:2x2x1
jax: 0.10.0
libtpu: 0.0.40
codegen_flags: <defaults>
</compile_context>

<pallas_src>
import functools

import jax
import jax.numpy as jnp
import numpy as np
from jax.experimental import pallas as pl
from jax.experimental.pallas import tpu as pltpu


def _bottleneck_kernel(x_ref,
                       wcat_ref, bcat_ref,     # fused [downsample; conv1], BN-scaled rows
                       w2s_ref, b2_ref,        # stacked 3x3 weights (width, 9*width)
                       w3_ref, b3_ref,         # conv3 (BN-scaled rows)
                       mask_ref,               # (9, 1, HW) spatial validity masks
                       o_ref,
                       taps_ref,               # VMEM scratch (9*width, HW)
                       *, H, W, width, cout):
    """One image per grid step.  Activations live as (C, H*W): lane-dense."""
    HW = H * W
    hp = jax.lax.Precision.HIGHEST
    x = x_ref[0]                                              # (Cin, HW) f32

    # ---- conv1 (1x1) + downsample (1x1), fused single matmul ------------
    t = jnp.dot(wcat_ref[...], x,
                preferred_element_type=jnp.float32, precision=hp) + bcat_ref[...]
    idn = t[:cout, :]                                         # downsample+bn (8-aligned)
    t1 = jnp.maximum(t[cout:, :], 0.0)                        # conv1+bn1+relu (8-aligned)

    # ---- conv2 (3x3, stride=1, pad=1) + bn2 + relu -----------------------
    # Build all 9 shifted+masked taps into one (9*width, HW) operand, then a
    # single K=9*width MXU matmul (better systolic fill, one result drain).
    k = 0
    for dy in (-1, 0, 1):
        for dx in (-1, 0, 1):
            s = dy * W + dx
            shifted = t1 if s == 0 else pltpu.roll(t1, shift=(-s) % HW, axis=1)
            taps_ref[pl.ds(k * width, width), :] = shifted * mask_ref[k]
            k += 1
    acc = jnp.dot(w2s_ref[...], taps_ref[...],
                  preferred_element_type=jnp.float32, precision=hp)
    t2 = jnp.maximum(acc + b2_ref[...], 0.0)                  # (width, HW)

    # ---- conv3 (1x1) + bn3 + residual add + relu -------------------------
    t3 = jnp.dot(w3_ref[...], t2,
                 preferred_element_type=jnp.float32, precision=hp) + b3_ref[...]
    o_ref[0] = jnp.maximum(t3 + idn, 0.0).astype(o_ref.dtype)


def bottleneck_forward(x_nchw, params):
    (w1, s1, b1, w2, s2, b2, w3, s3, b3, wd, sd, bd) = params
    N, Cin, H, W = x_nchw.shape
    width = w1.shape[0]
    cout = w3.shape[0]
    HW = H * W

    # Free reshape (contiguous trailing dims) -- no transpose anywhere.
    x = x_nchw.reshape(N, Cin, HW).astype(jnp.float32)

    # BN scales folded into conv weights (one-time parameter transform).
    # Downsample rows FIRST so both slices of the fused output are 8-aligned.
    wcat = jnp.concatenate([sd[:, None] * wd, s1[:, None] * w1], axis=0)  # (cout+width, Cin)
    bcat = jnp.concatenate([bd, b1], axis=0)[:, None]                     # (cout+width, 1)

    # conv2 weight (O, I, Kh, Kw) -> per-tap (9, O, I), tap k = ky*3+kx,
    # then stacked to (O, 9*I) with the bn2 scale folded into rows.
    w29 = jnp.transpose(w2, (2, 3, 0, 1)).reshape(9, width, width)
    w2s = s2[:, None] * jnp.transpose(w29, (1, 0, 2)).reshape(width, 9 * width)
    b2c = b2[:, None]

    w3f = s3[:, None] * w3                                                # (cout, width)
    b3c = b3[:, None]

    # 9 spatial validity masks for the stride-1 / pad-1 3x3 conv, precomputed
    # once here instead of re-deriving iota//%/compares every grid step.
    yy, xx = np.meshgrid(np.arange(H), np.arange(W), indexing="ij")
    masks = np.stack([
        (((yy + dy) >= 0) & ((yy + dy) < H) & ((xx + dx) >= 0) & ((xx + dx) < W))
        .reshape(1, HW).astype(np.float32)
        for dy in (-1, 0, 1) for dx in (-1, 0, 1)
    ], axis=0)                                                            # (9, 1, HW)
    masks = jnp.asarray(masks)

    kernel = functools.partial(_bottleneck_kernel, H=H, W=W,
                               width=width, cout=cout)

    def full(a):
        nd = a.ndim
        return pl.BlockSpec(a.shape, lambda n, _nd=nd: (0,) * _nd)

    grid_spec = pltpu.PrefetchScalarGridSpec(
        num_scalar_prefetch=0,
        grid=(N,),
        in_specs=[
            pl.BlockSpec((1, Cin, HW), lambda n: (n, 0, 0)),
            full(wcat), full(bcat),
            full(w2s), full(b2c),
            full(w3f), full(b3c),
            full(masks),
        ],
        out_specs=pl.BlockSpec((1, cout, HW), lambda n: (n, 0, 0)),
        scratch_shapes=[pltpu.VMEM((9 * width, HW), jnp.float32)],
    )
    out = pl.pallas_call(
        kernel,
        out_shape=jax.ShapeDtypeStruct((N, cout, HW), jnp.float32),
        grid_spec=grid_spec,
        compiler_params=pltpu.CompilerParams(
            dimension_semantics=("parallel",)),   # v7x: one image per TensorCore
    )(x, wcat, bcat, w2s, b2c, w3f, b3c, masks)
    return out.reshape(N, cout, H, W)                                     # free reshape


def bottleneck_reference(x, params):
    """Pure-JAX reference in NCHW (same math, eval-mode folded BN)."""
    (w1, s1, b1, w2, s2, b2, w3, s3, b3, wd, sd, bd) = params
    hp = jax.lax.Precision.HIGHEST

    def conv1x1(t, w):  # w: (O, I)
        return jax.lax.conv_general_dilated(
            t, w[:, :, None, None], (1, 1), 'VALID',
            dimension_numbers=('NCHW', 'OIHW', 'NCHW'), precision=hp)

    def bn(t, s, b):
        return t * s[None, :, None, None] + b[None, :, None, None]

    t = jax.nn.relu(bn(conv1x1(x, w1), s1, b1))
    t = jax.lax.conv_general_dilated(
        t, w2, (1, 1), 'SAME',
        dimension_numbers=('NCHW', 'OIHW', 'NCHW'), precision=hp)
    t = jax.nn.relu(bn(t, s2, b2))
    t = bn(conv1x1(t, w3), s3, b3)
    idn = bn(conv1x1(x, wd), sd, bd)
    return jax.nn.relu(t + idn)


if __name__ == "__main__":
    # Module config: Bottleneck(inplanes=4, planes=4) -> width=4, out=16,
    # downsample branch active (inplanes != planes*expansion).
    inplanes, planes, expansion = 4, 4, 4
    width = planes                       # base_width=64, groups=1
    cout = planes * expansion
    N, H, W = 2, 16, 16

    key = jax.random.PRNGKey(0)
    kx, kw1, kw2, kw3, kwd, kb1, kb2, kb3, kbd = jax.random.split(key, 9)
    x = jax.random.normal(kx, (N, inplanes, H, W), jnp.float32)   # NCHW input

    def bn_fold(k, c):
        k1, k2, k3, k4 = jax.random.split(k, 4)
        gamma = 1.0 + 0.1 * jax.random.normal(k1, (c,), jnp.float32)
        beta = 0.1 * jax.random.normal(k2, (c,), jnp.float32)
        mean = 0.1 * jax.random.normal(k3, (c,), jnp.float32)
        var = 0.5 + jnp.abs(jax.random.normal(k4, (c,), jnp.float32))
        scale = gamma / jnp.sqrt(var + 1e-5)
        bias = beta - mean * scale
        return scale, bias

    # PyTorch-oriented weights: conv1x1 -> (O, I); conv3x3 -> (O, I, 3, 3).
    w1 = 0.2 * jax.random.normal(kw1, (width, inplanes), jnp.float32)
    w2 = 0.1 * jax.random.normal(kw2, (width, width, 3, 3), jnp.float32)
    w3 = 0.2 * jax.random.normal(kw3, (cout, width), jnp.float32)
    wd = 0.2 * jax.random.normal(kwd, (cout, inplanes), jnp.float32)
    s1, b1 = bn_fold(kb1, width)
    s2, b2 = bn_fold(kb2, width)
    s3, b3 = bn_fold(kb3, cout)
    sd, bd = bn_fold(kbd, cout)

    params = (w1, s1, b1, w2, s2, b2, w3, s3, b3, wd, sd, bd)

    out = jax.block_until_ready(bottleneck_forward(x, params))
    ref = bottleneck_reference(x, params)
    if not np.allclose(np.asarray(out), np.asarray(ref), rtol=1e-5, atol=1e-5):
        max_err = float(np.max(np.abs(np.asarray(out) - np.asarray(ref))))
        raise AssertionError(f"mismatch vs reference, max abs err = {max_err}")

    print("KERNEL_OK")
</pallas_src>

<mosaic_0001>
module attributes {stable_mosaic.version = 11 : i64} {
  func.func @_bottleneck_kernel(%arg0: i32, %arg1: memref<1x4x256xf32, #tpu.memory_space<vmem>>, %arg2: memref<20x4xf32, #tpu.memory_space<vmem>>, %arg3: memref<20x1xf32, #tpu.memory_space<vmem>>, %arg4: memref<4x36xf32, #tpu.memory_space<vmem>>, %arg5: memref<4x1xf32, #tpu.memory_space<vmem>>, %arg6: memref<16x4xf32, #tpu.memory_space<vmem>>, %arg7: memref<16x1xf32, #tpu.memory_space<vmem>>, %arg8: memref<9x1x256xf32, #tpu.memory_space<vmem>>, %arg9: memref<1x16x256xf32, #tpu.memory_space<vmem>>, %arg10: memref<36x256xf32, #tpu.memory_space<vmem>>) attributes {dimension_semantics = [#tpu.dimension_semantics<parallel>], iteration_bounds = array<i64: 2>, scalar_prefetch = 0 : i64, scratch_operands = 1 : i64, tpu.core_type = #tpu.core_type<tc>, window_params = [{transform_indices = @transform_0, window_bounds = array<i64: 1, 4, 256>}, {pipeline_mode = #tpu.pipeline_mode<synchronous>, transform_indices = @transform_1, window_bounds = array<i64: 20, 4>}, {pipeline_mode = #tpu.pipeline_mode<synchronous>, transform_indices = @transform_2, window_bounds = array<i64: 20, 1>}, {pipeline_mode = #tpu.pipeline_mode<synchronous>, transform_indices = @transform_3, window_bounds = array<i64: 4, 36>}, {pipeline_mode = #tpu.pipeline_mode<synchronous>, transform_indices = @transform_4, window_bounds = array<i64: 4, 1>}, {pipeline_mode = #tpu.pipeline_mode<synchronous>, transform_indices = @transform_5, window_bounds = array<i64: 16, 4>}, {pipeline_mode = #tpu.pipeline_mode<synchronous>, transform_indices = @transform_6, window_bounds = array<i64: 16, 1>}, {pipeline_mode = #tpu.pipeline_mode<synchronous>, transform_indices = @transform_7, window_bounds = array<i64: 9, 1, 256>}, {transform_indices = @transform_8, window_bounds = array<i64: 1, 16, 256>}]} {
    %c0 = arith.constant 0 : index
    %c0_0 = arith.constant 0 : index
    %c0_1 = arith.constant 0 : index
    %0 = vector.load %arg1[%c0, %c0_0, %c0_1] : memref<1x4x256xf32, #tpu.memory_space<vmem>>, vector<1x4x256xf32>
    %1 = vector.shape_cast %0 : vector<1x4x256xf32> to vector<4x256xf32>
    %c0_2 = arith.constant 0 : index
    %c0_3 = arith.constant 0 : index
    %2 = vector.load %arg2[%c0_2, %c0_3] : memref<20x4xf32, #tpu.memory_space<vmem>>, vector<20x4xf32>
    %cst = arith.constant dense<0.000000e+00> : vector<20x256xf32>
    %3 = tpu.matmul %2, %1, %cst {dimension_numbers = #tpu.dot_dimension_numbers<[1], [0], [0], [1], [0, 0, 1, 1], [], []>, precision = #tpu.contract_precision<fp32>} : vector<20x4xf32>, vector<4x256xf32>, vector<20x256xf32> -> vector<20x256xf32>
    %c0_4 = arith.constant 0 : index
    %c0_5 = arith.constant 0 : index
    %4 = vector.load %arg3[%c0_4, %c0_5] : memref<20x1xf32, #tpu.memory_space<vmem>>, vector<20x1xf32>
    %5 = vector.broadcast %4 : vector<20x1xf32> to vector<20x256xf32>
    %6 = arith.addf %3, %5 : vector<20x256xf32>
    %7 = vector.extract_strided_slice %6 {offsets = [0, 0], sizes = [16, 256], strides = [1, 1]} : vector<20x256xf32> to vector<16x256xf32>
    %8 = vector.extract_strided_slice %6 {offsets = [16, 0], sizes = [4, 256], strides = [1, 1]} : vector<20x256xf32> to vector<4x256xf32>
    %cst_6 = arith.constant 0.000000e+00 : f32
    %9 = vector.broadcast %cst_6 : f32 to vector<4x256xf32>
    %10 = arith.maximumf %8, %9 : vector<4x256xf32>
    %c17_i32 = arith.constant 17 : i32
    %11 = tpu.dynamic_rotate %10 by %c17_i32 dim 1 : vector<4x256xf32>, i32 -> vector<4x256xf32>
    %c0_7 = arith.constant 0 : index
    %c0_8 = arith.constant 0 : index
    %c0_9 = arith.constant 0 : index
    %12 = vector.load %arg8[%c0_7, %c0_8, %c0_9] : memref<9x1x256xf32, #tpu.memory_space<vmem>>, vector<1x1x256xf32>
    %13 = vector.shape_cast %12 : vector<1x1x256xf32> to vector<1x256xf32>
    %14 = vector.broadcast %13 : vector<1x256xf32> to vector<4x256xf32>
    %15 = arith.mulf %11, %14 : vector<4x256xf32>
    %c0_10 = arith.constant 0 : index
    %c0_11 = arith.constant 0 : index
    %16 = vector.load %arg10[%c0_10, %c0_11] : memref<36x256xf32, #tpu.memory_space<vmem>>, vector<4x256xf32>
    tpu.vector_store %arg10[%c0_10, %c0_11], %15 {strides = array<i32>} : memref<36x256xf32, #tpu.memory_space<vmem>>, vector<4x256xf32>,
    %c16_i32 = arith.constant 16 : i32
    %17 = tpu.dynamic_rotate %10 by %c16_i32 dim 1 : vector<4x256xf32>, i32 -> vector<4x256xf32>
    %c1 = arith.constant 1 : index
    %c0_12 = arith.constant 0 : index
    %c0_13 = arith.constant 0 : index
    %18 = vector.load %arg8[%c1, %c0_12, %c0_13] : memref<9x1x256xf32, #tpu.memory_space<vmem>>, vector<1x1x256xf32>
    %19 = vector.shape_cast %18 : vector<1x1x256xf32> to vector<1x256xf32>
    %20 = vector.broadcast %19 : vector<1x256xf32> to vector<4x256xf32>
    %21 = arith.mulf %17, %20 : vector<4x256xf32>
    %c4 = arith.constant 4 : index
    %c0_14 = arith.constant 0 : index
    %22 = vector.load %arg10[%c4, %c0_14] : memref<36x256xf32, #tpu.memory_space<vmem>>, vector<4x256xf32>
    tpu.vector_store %arg10[%c4, %c0_14], %21 {strides = array<i32>} : memref<36x256xf32, #tpu.memory_space<vmem>>, vector<4x256xf32>,
    %c15_i32 = arith.constant 15 : i32
    %23 = tpu.dynamic_rotate %10 by %c15_i32 dim 1 : vector<4x256xf32>, i32 -> vector<4x256xf32>
    %c2 = arith.constant 2 : index
    %c0_15 = arith.constant 0 : index
    %c0_16 = arith.constant 0 : index
    %24 = vector.load %arg8[%c2, %c0_15, %c0_16] : memref<9x1x256xf32, #tpu.memory_space<vmem>>, vector<1x1x256xf32>
    %25 = vector.shape_cast %24 : vector<1x1x256xf32> to vector<1x256xf32>
    %26 = vector.broadcast %25 : vector<1x256xf32> to vector<4x256xf32>
    %27 = arith.mulf %23, %26 : vector<4x256xf32>
    %c8 = arith.constant 8 : index
    %c0_17 = arith.constant 0 : index
    %28 = vector.load %arg10[%c8, %c0_17] : memref<36x256xf32, #tpu.memory_space<vmem>>, vector<4x256xf32>
    tpu.vector_store %arg10[%c8, %c0_17], %27 {strides = array<i32>} : memref<36x256xf32, #tpu.memory_space<vmem>>, vector<4x256xf32>,
    %c1_i32 = arith.constant 1 : i32
    %29 = tpu.dynamic_rotate %10 by %c1_i32 dim 1 : vector<4x256xf32>, i32 -> vector<4x256xf32>
    %c3 = arith.constant 3 : index
    %c0_18 = arith.constant 0 : index
    %c0_19 = arith.constant 0 : index
    %30 = vector.load %arg8[%c3, %c0_18, %c0_19] : memref<9x1x256xf32, #tpu.memory_space<vmem>>, vector<1x1x256xf32>
    %31 = vector.shape_cast %30 : vector<1x1x256xf32> to vector<1x256xf32>
    %32 = vector.broadcast %31 : vector<1x256xf32> to vector<4x256xf32>
    %33 = arith.mulf %29, %32 : vector<4x256xf32>
    %c12 = arith.constant 12 : index
    %c0_20 = arith.constant 0 : index
    %34 = vector.load %arg10[%c12, %c0_20] : memref<36x256xf32, #tpu.memory_space<vmem>>, vector<4x256xf32>
    tpu.vector_store %arg10[%c12, %c0_20], %33 {strides = array<i32>} : memref<36x256xf32, #tpu.memory_space<vmem>>, vector<4x256xf32>,
    %c4_21 = arith.constant 4 : index
    %c0_22 = arith.constant 0 : index
    %c0_23 = arith.constant 0 : index
    %35 = vector.load %arg8[%c4_21, %c0_22, %c0_23] : memref<9x1x256xf32, #tpu.memory_space<vmem>>, vector<1x1x256xf32>
    %36 = vector.shape_cast %35 : vector<1x1x256xf32> to vector<1x256xf32>
    %37 = vector.broadcast %36 : vector<1x256xf32> to vector<4x256xf32>
    %38 = arith.mulf %10, %37 : vector<4x256xf32>
    %c16 = arith.constant 16 : index
    %c0_24 = arith.constant 0 : index
    %39 = vector.load %arg10[%c16, %c0_24] : memref<36x256xf32, #tpu.memory_space<vmem>>, vector<4x256xf32>
    tpu.vector_store %arg10[%c16, %c0_24], %38 {strides = array<i32>} : memref<36x256xf32, #tpu.memory_space<vmem>>, vector<4x256xf32>,
    %c255_i32 = arith.constant 255 : i32
    %40 = tpu.dynamic_rotate %10 by %c255_i32 dim 1 : vector<4x256xf32>, i32 -> vector<4x256xf32>
    %c5 = arith.constant 5 : index
    %c0_25 = arith.constant 0 : index
    %c0_26 = arith.constant 0 : index
    %41 = vector.load %arg8[%c5, %c0_25, %c0_26] : memref<9x1x256xf32, #tpu.memory_space<vmem>>, vector<1x1x256xf32>
    %42 = vector.shape_cast %41 : vector<1x1x256xf32> to vector<1x256xf32>
    %43 = vector.broadcast %42 : vector<1x256xf32> to vector<4x256xf32>
    %44 = arith.mulf %40, %43 : vector<4x256xf32>
    %c20 = arith.constant 20 : index
    %c0_27 = arith.constant 0 : index
    %45 = vector.load %arg10[%c20, %c0_27] : memref<36x256xf32, #tpu.memory_space<vmem>>, vector<4x256xf32>
    tpu.vector_store %arg10[%c20, %c0_27], %44 {strides = array<i32>} : memref<36x256xf32, #tpu.memory_space<vmem>>, vector<4x256xf32>,
    %c241_i32 = arith.constant 241 : i32
    %46 = tpu.dynamic_rotate %10 by %c241_i32 dim 1 : vector<4x256xf32>, i32 -> vector<4x256xf32>
    %c6 = arith.constant 6 : index
    %c0_28 = arith.constant 0 : index
    %c0_29 = arith.constant 0 : index
    %47 = vector.load %arg8[%c6, %c0_28, %c0_29] : memref<9x1x256xf32, #tpu.memory_space<vmem>>, vector<1x1x256xf32>
    %48 = vector.shape_cast %47 : vector<1x1x256xf32> to vector<1x256xf32>
    %49 = vector.broadcast %48 : vector<1x256xf32> to vector<4x256xf32>
    %50 = arith.mulf %46, %49 : vector<4x256xf32>
    %c24 = arith.constant 24 : index
    %c0_30 = arith.constant 0 : index
    %51 = vector.load %arg10[%c24, %c0_30] : memref<36x256xf32, #tpu.memory_space<vmem>>, vector<4x256xf32>
    tpu.vector_store %arg10[%c24, %c0_30], %50 {strides = array<i32>} : memref<36x256xf32, #tpu.memory_space<vmem>>, vector<4x256xf32>,
    %c240_i32 = arith.constant 240 : i32
    %52 = tpu.dynamic_rotate %10 by %c240_i32 dim 1 : vector<4x256xf32>, i32 -> vector<4x256xf32>
    %c7 = arith.constant 7 : index
    %c0_31 = arith.constant 0 : index
    %c0_32 = arith.constant 0 : index
    %53 = vector.load %arg8[%c7, %c0_31, %c0_32] : memref<9x1x256xf32, #tpu.memory_space<vmem>>, vector<1x1x256xf32>
    %54 = vector.shape_cast %53 : vector<1x1x256xf32> to vector<1x256xf32>
    %55 = vector.broadcast %54 : vector<1x256xf32> to vector<4x256xf32>
    %56 = arith.mulf %52, %55 : vector<4x256xf32>
    %c28 = arith.constant 28 : index
    %c0_33 = arith.constant 0 : index
    %57 = vector.load %arg10[%c28, %c0_33] : memref<36x256xf32, #tpu.memory_space<vmem>>, vector<4x256xf32>
    tpu.vector_store %arg10[%c28, %c0_33], %56 {strides = array<i32>} : memref<36x256xf32, #tpu.memory_space<vmem>>, vector<4x256xf32>,
    %c239_i32 = arith.constant 239 : i32
    %58 = tpu.dynamic_rotate %10 by %c239_i32 dim 1 : vector<4x256xf32>, i32 -> vector<4x256xf32>
    %c8_34 = arith.constant 8 : index
    %c0_35 = arith.constant 0 : index
    %c0_36 = arith.constant 0 : index
    %59 = vector.load %arg8[%c8_34, %c0_35, %c0_36] : memref<9x1x256xf32, #tpu.memory_space<vmem>>, vector<1x1x256xf32>
    %60 = vector.shape_cast %59 : vector<1x1x256xf32> to vector<1x256xf32>
    %61 = vector.broadcast %60 : vector<1x256xf32> to vector<4x256xf32>
    %62 = arith.mulf %58, %61 : vector<4x256xf32>
    %c32 = arith.constant 32 : index
    %c0_37 = arith.constant 0 : index
    %63 = vector.load %arg10[%c32, %c0_37] : memref<36x256xf32, #tpu.memory_space<vmem>>, vector<4x256xf32>
    tpu.vector_store %arg10[%c32, %c0_37], %62 {strides = array<i32>} : memref<36x256xf32, #tpu.memory_space<vmem>>, vector<4x256xf32>,
    %c0_38 = arith.constant 0 : index
    %c0_39 = arith.constant 0 : index
    %64 = vector.load %arg4[%c0_38, %c0_39] : memref<4x36xf32, #tpu.memory_space<vmem>>, vector<4x36xf32>
    %c0_40 = arith.constant 0 : index
    %c0_41 = arith.constant 0 : index
    %65 = vector.load %arg10[%c0_40, %c0_41] : memref<36x256xf32, #tpu.memory_space<vmem>>, vector<36x256xf32>
    %cst_42 = arith.constant dense<0.000000e+00> : vector<4x256xf32>
    %66 = tpu.matmul %64, %65, %cst_42 {dimension_numbers = #tpu.dot_dimension_numbers<[1], [0], [0], [1], [0, 0, 1, 1], [], []>, precision = #tpu.contract_precision<fp32>} : vector<4x36xf32>, vector<36x256xf32>, vector<4x256xf32> -> vector<4x256xf32>
    %c0_43 = arith.constant 0 : index
    %c0_44 = arith.constant 0 : index
    %67 = vector.load %arg5[%c0_43, %c0_44] : memref<4x1xf32, #tpu.memory_space<vmem>>, vector<4x1xf32>
    %68 = vector.broadcast %67 : vector<4x1xf32> to vector<4x256xf32>
    %69 = arith.addf %66, %68 : vector<4x256xf32>
    %cst_45 = arith.constant 0.000000e+00 : f32
    %70 = vector.broadcast %cst_45 : f32 to vector<4x256xf32>
    %71 = arith.maximumf %69, %70 : vector<4x256xf32>
    %c0_46 = arith.constant 0 : index
    %c0_47 = arith.constant 0 : index
    %72 = vector.load %arg6[%c0_46, %c0_47] : memref<16x4xf32, #tpu.memory_space<vmem>>, vector<16x4xf32>
    %cst_48 = arith.constant dense<0.000000e+00> : vector<16x256xf32>
    %73 = tpu.matmul %72, %71, %cst_48 {dimension_numbers = #tpu.dot_dimension_numbers<[1], [0], [0], [1], [0, 0, 1, 1], [], []>, precision = #tpu.contract_precision<fp32>} : vector<16x4xf32>, vector<4x256xf32>, vector<16x256xf32> -> vector<16x256xf32>
    %c0_49 = arith.constant 0 : index
    %c0_50 = arith.constant 0 : index
    %74 = vector.load %arg7[%c0_49, %c0_50] : memref<16x1xf32, #tpu.memory_space<vmem>>, vector<16x1xf32>
    %75 = vector.broadcast %74 : vector<16x1xf32> to vector<16x256xf32>
    %76 = arith.addf %73, %75 : vector<16x256xf32>
    %77 = arith.addf %76, %7 : vector<16x256xf32>
    %cst_51 = arith.constant 0.000000e+00 : f32
    %78 = vector.broadcast %cst_51 : f32 to vector<16x256xf32>
    %79 = arith.maximumf %77, %78 : vector<16x256xf32>
    %c0_52 = arith.constant 0 : index
    %c0_53 = arith.constant 0 : index
    %c0_54 = arith.constant 0 : index
    %80 = vector.load %arg9[%c0_52, %c0_53, %c0_54] : memref<1x16x256xf32, #tpu.memory_space<vmem>>, vector<1x16x256xf32>
    %81 = vector.shape_cast %80 : vector<1x16x256xf32> to vector<16x256xf32>
    %82 = vector.shape_cast %79 : vector<16x256xf32> to vector<1x16x256xf32>
    tpu.vector_store %arg9[%c0_52, %c0_53, %c0_54], %82 {strides = array<i32>} : memref<1x16x256xf32, #tpu.memory_space<vmem>>, vector<1x16x256xf32>,
    return
  }
  func.func @transform_0(%arg0: i32) -> (i32, i32, i32) {
    %c0_i32 = arith.constant 0 : i32
    %c0_i32_0 = arith.constant 0 : i32
    %c0_i32_1 = arith.constant 0 : i32
    return %arg0, %c0_i32, %c0_i32_0 : i32, i32, i32
  }
  func.func @transform_1(%arg0: i32) -> (i32, i32) {
    %c0_i32 = arith.constant 0 : i32
    %c0_i32_0 = arith.constant 0 : i32
    %c0_i32_1 = arith.constant 0 : i32
    return %c0_i32, %c0_i32_0 : i32, i32
  }
  func.func @transform_2(%arg0: i32) -> (i32, i32) {
    %c0_i32 = arith.constant 0 : i32
    %c0_i32_0 = arith.constant 0 : i32
    %c0_i32_1 = arith.constant 0 : i32
    return %c0_i32, %c0_i32_0 : i32, i32
  }
  func.func @transform_3(%arg0: i32) -> (i32, i32) {
    %c0_i32 = arith.constant 0 : i32
    %c0_i32_0 = arith.constant 0 : i32
    %c0_i32_1 = arith.constant 0 : i32
    return %c0_i32, %c0_i32_0 : i32, i32
  }
  func.func @transform_4(%arg0: i32) -> (i32, i32) {
    %c0_i32 = arith.constant 0 : i32
    %c0_i32_0 = arith.constant 0 : i32
    %c0_i32_1 = arith.constant 0 : i32
    return %c0_i32, %c0_i32_0 : i32, i32
  }
  func.func @transform_5(%arg0: i32) -> (i32, i32) {
    %c0_i32 = arith.constant 0 : i32
    %c0_i32_0 = arith.constant 0 : i32
    %c0_i32_1 = arith.constant 0 : i32
    return %c0_i32, %c0_i32_0 : i32, i32
  }
  func.func @transform_6(%arg0: i32) -> (i32, i32) {
    %c0_i32 = arith.constant 0 : i32
    %c0_i32_0 = arith.constant 0 : i32
    %c0_i32_1 = arith.constant 0 : i32
    return %c0_i32, %c0_i32_0 : i32, i32
  }
  func.func @transform_7(%arg0: i32) -> (i32, i32, i32) {
    %c0_i32 = arith.constant 0 : i32
    %c0_i32_0 = arith.constant 0 : i32
    %c0_i32_1 = arith.constant 0 : i32
    %c0_i32_2 = arith.constant 0 : i32
    return %c0_i32, %c0_i32_0, %c0_i32_1 : i32, i32, i32
  }
  func.func @transform_8(%arg0: i32) -> (i32, i32, i32) {
    %c0_i32 = arith.constant 0 : i32
    %c0_i32_0 = arith.constant 0 : i32
    %c0_i32_1 = arith.constant 0 : i32
    return %arg0, %c0_i32, %c0_i32_0 : i32, i32, i32
  }
}

</mosaic_0001>

<bundles_post_ra>
// kernel: tpu_custom_call.1
= control target key start
LH: loop header
LB: loop body
LE: loop exit
PB: predicated region body
PF: predicated region fallthrough
CT: control target
= control target key end

     0   :  { %13 = vsyncpa [#allocation4], 0  ;;  %s3075_s0 = inlined_call_operand.vmem [shape: f32[2,4,256], index: 0, kind: input, shape index: {}]   ;;  %s3076_s1 = inlined_call_operand.vmem [shape: f32[20,4], index: 1, kind: input, shape index: {}]   ;;  %s3077_s2 = inlined_call_operand.vmem [shape: f32[20,1], index: 2, kind: input, shape index: {}]   ;;  %s3078_s3 = inlined_call_operand.vmem [shape: f32[4,36], index: 3, kind: input, shape index: {}]   ;;  %s3079_s4 = inlined_call_operand.vmem [shape: f32[4,1], index: 4, kind: input, shape index: {}]   ;;  %s3080_s5 = inlined_call_operand.vmem [shape: f32[16,4], index: 5, kind: input, shape index: {}]   ;;  %s3081_s6 = inlined_call_operand.vmem [shape: f32[16,1], index: 6, kind: input, shape index: {}]   ;;  %s3082_s7 = inlined_call_operand.vmem [shape: f32[9,1,256], index: 7, kind: input, shape index: {}]   ;;  %s3083_s8 = inlined_call_operand.hbm [shape: f32[2,16,256], index: 8, kind: output, shape index: {}]  }
   0x1   :  { %15 = vsyncpa [#allocation4 + $0x1], 0  ;;  %s2562_s27 = smov 0   ;;  %s2564_s28 = smov 0  }
   0x2   :  { %s2566_s29 = smov 0   ;;  %s2568_s30 = smov 0  }
   0x3 LB: > { %s2583_s9 = sadd.s32 4294967295, %s2503_s30   ;;  %s2368_s10 = sadd.s32 4294967294, %s2503_s30   ;;  %s2503_s30 = sphi %s2568_s30, %s3097_s30   ;;  %s2499_s29 = sphi %s2566_s29, %s3096_s29   ;;  %s2495_s28 = sphi %s2564_s28, %s3095_s28   ;;  %s2491_s27 = sphi %s2562_s27, %s3094_s27  }
   0x4   : > { %s2587_s11 = sadd.s32 1, %s2503_s30   ;;  %s201_s12 = sadd.s32 1, %s2499_s29 }
   0x5   : > { %s198_s13 = ssub.s32 %s2503_s30, %s2587_s11  ;;  %p211_p0 = scmp.ne.s32.totalorder %s2499_s29, %s2495_s28 }
   0x6   : > { %p199_p1 = scmp.eq.s32.totalorder %s198_s13, 0  ;;  %p212_p2 = scmp.eq.s32.totalorder %s2583_s9, 1 }
   0x7   : > { %p217_p3 = scmp.ne.s32.totalorder %s2495_s28, %s2491_s27  ;;  %p218_p4 = scmp.eq.s32.totalorder %s2368_s10, 1 }
   0x8   : > { %s2598_s14 = scalar_select %p199_p1, %s2499_s29, %s201_s12  }
   0x9   : > { %p2600_p5 = por %p212_p2, %p211_p0  ;;  %p2604_p6 = por %p218_p4, %p217_p3 }
   0xa   : > { %p2371_p7 = scmp.ge.s32.totalorder %s2503_s30, 1  ;;  %p265_p8 = scmp.lt.s32.totalorder %s2503_s30, 3 }
   0xc   : > { %p266_p9 = pnand %p2371_p7, %p265_p8 }
   0xd   : > { %p299_p10 = scmp.lt.s32.totalorder (!%p266_p9), %s2583_s9, 1  ;;  %s2507_s19 = smov (!%p266_p9), 112  }
   0xe   : > { %269 = sbr.rel (%p266_p9) target bundleno = 906 (0x38a), region = 52  ;;  %s2508_s20 = smov (!%p266_p9), 111  }
   0xf   : > { %s2509_s21 = smov (!%p266_p9), 127   ;;  %s2510_s22 = smov (!%p266_p9), 113  }
  0x10   : > { %s2512_s24 = smov (!%p266_p9), 16   ;;  %s2513_s25 = smov (!%p266_p9), 15  }
  0x11   : > { %s2389_s10 = sshll.u32 (!%p266_p9), %s2583_s9, 9 }
  0x12   : > { %s3030_s17 = scalar_lea.hbm (!%p266_p9), %s3083_s8, %s2389_s10 }
  0x13   : > { %v305_v0 = vld [vmem:[%s3076_s1] sm:$0xff]  ;;  %vm328_vm0 = vcmask 31744   ;;  %v306_v1 = vld [vmem:[%s3076_s1 + $0x8] sm:$0xff]  ;;  %v2505_v2 = vmov 0.0   ;;  %v307_v5 = vld [vmem:[%s3076_s1 + $0x10] sm:$0xf] }
  0x14   : > { %409 = vmatprep.mubr.f32.mxu0 %v2505_v2  ;;  %v330_v3 = vsel %vm328_vm0, %v305_v0, 0  ;;  %v333_v4 = vsel %vm328_vm0, %v306_v1, 0  ;;  %517 = vmatprep.mubr.f32.mxu1 %v2505_v2  ;;  %s300_s23 = scalar_select %p299_p10, %s2583_s9, 1  ;;  %v336_v8 = vsel %vm328_vm0, %v307_v5, 0  ;;  %v2506_v9 = vmov 0  }
  0x15   : > { %v2625_v6 = vand.u32 4294901760, %v330_v3  ;;  %v2627_v7 = vand.u32 4294901760, %v333_v4  ;;  %2440 = vset.pattern.permute.xlu0 %v2506_v9  ;;  %v310_v10 = vld [vmem:[%s3077_s2 + $0x10] sm:$0xf]  ;;  %2441 = vset.pattern.permute.xlu1 %v2506_v9  ;;  %v2633_v11 = vand.u32 4294901760, %v336_v8  ;;  %vm338_vm1 = vcmask 1043456  }
  0x16   : > { %323 = vperm.xlu0 %2440, %v310_v10   ;;  %s2388_s26 = sshll.u32 %s300_s23, 3  ;;  %s2511_s23 = smov 1   ;;  %vm1159_vm8 = vcmask 293888  }
  0x17   : > { %v411_v12 = vsub.f32 %v330_v3, %v2625_v6  ;;  %v422_v13 = vsub.f32 %v333_v4, %v2627_v7  ;;  %s303_s13 = scalar_lea.vmem %s3075_s0, %s2388_s26  ;;  %v433_v14 = vsub.f32 %v336_v8, %v2633_v11  ;;  %v912_v3 = vlaneseq  ;;  %s2514_s26 = smov 17  }
  0x18   : > { %v304_v15 = vld [vmem:[%s303_s13] sm:$0xff] }
  0x19   : > { %v412_v16 = vand.u32 4294901760, %v411_v12  ;;  %v423_v17 = vand.u32 4294901760, %v422_v13  ;;  %v327_v18 = vcombine.high %v304_v15, %v304_v15  ;;  %v339_v19 = vsel %vm338_vm1, %v304_v15, 0 }
  0x1a   : > { %v375_v20 = vand.u32 4294901760, %v339_v19  ;;  %v434_v23 = vand.u32 4294901760, %v433_v14  ;;  %v920_v9 = vshrl.u32 %v912_v3, 7 }
  0x1b   : > { %v413_v21 = vsub.f32 %v411_v12, %v412_v16  ;;  %v341_v22 = vsel %vm338_vm1, %v327_v18, 0  ;;  %v424_v26 = vsub.f32 %v422_v13, %v423_v17 }
  0x1c   : > { %v373_v24 = vand.u32 4294901760, %v341_v22  ;;  %v480_v27 = vsub.f32 %v339_v19, %v375_v20  ;;  %v435_v33 = vsub.f32 %v433_v14, %v434_v23 }
  0x1d   : > { %v414_v25 = vand.u32 4294901760, %v413_v21  ;;  %v425_v30 = vand.u32 4294901760, %v424_v26 }
  0x1e   : > { %374 = vmatprep.subr.mxu0 %v373_v24  ;;  %v474_v28 = vsub.f32 %v341_v22, %v373_v24  ;;  %v481_v29 = vand.u32 4294901760, %v480_v27  ;;  %v436_v37 = vand.u32 4294901760, %v435_v33 }
  0x1f   : > { %376 = vmatpush1.msra.mxu0 %v375_v20 }
  0x20   : > { %415 = vmatmul.mubr.f32.vlgmr.msra.gmra.mxu0 %v414_v25  ;;  %v475_v31 = vand.u32 4294901760, %v474_v28  ;;  %v482_v32 = vsub.f32 %v480_v27, %v481_v29  ;;  %571 = vmatprep.subr.mxu0 %v474_v28 }
  0x21   : > { %420 = vmatprep.mubr.f32.mxu0 %v2505_v2  ;;  %574 = vmatpush1.msra.mxu0 %v480_v27 }
  0x22   : > { %v476_v34 = vsub.f32 %v474_v28, %v475_v31  ;;  %759 = vmatprep.subr.mxu0 %v475_v31  ;;  %v483_v35 = vand.u32 4294901760, %v482_v32 }
  0x24   : > { %426 = vmatmul.mubr.f32.gmra.mxu0 %v425_v30  ;;  %v477_v36 = vand.u32 4294901760, %v476_v34 }
  0x25   : > { %431 = vmatprep.mubr.f32.mxu0 %v2505_v2 }
  0x26   : > { %478 = vmatprep.subr.mxu1 %v477_v36  ;;  %v308_v36 = vld [vmem:[%s3077_s2] sm:$0xff] }
  0x27   : > { %484 = vmatpush1.msra.mxu1 %v483_v35  ;;  %v1153_v35 = vld [vmem:[%s3079_s4] sm:$0xf] }
  0x28   : > { %437 = vmatmul.mubr.f32.gmra.mxu0 %v436_v37  ;;  %519 = vmatmul.mubr.f32.vlgmr.msra.gmra.mxu1 %v2625_v6  ;;  %v309_v37 = vld [vmem:[%s3077_s2 + $0x8] sm:$0xff] }
  0x29   : > { %663 = vmatprep.subr.mxu1 %v373_v24  ;;  %524 = vmatprep.mubr.f32.mxu1 %v2505_v2 }
  0x2a   : > { %607 = vmatprep.mubr.f32.mxu0 %v2505_v2  ;;  %665 = vmatpush1.msra.mxu1 %v375_v20 }
  0x2b   : > { %849 = vmatprep.subr.mxu1 %v373_v24  ;;  %v2724_v24 = vsub.s32 1, %v920_v9 }
  0x2c   : > { %526 = vmatmul.mubr.f32.gmra.mxu1 %v2627_v7  ;;  %610 = vmatmul.mubr.f32.vlgmr.msra.gmra.mxu0 %v411_v12 }
  0x2d   : > { %531 = vmatprep.mubr.f32.mxu1 %v2505_v2  ;;  %615 = vmatprep.mubr.f32.mxu0 %v2505_v2 }
  0x2e   : > { %763 = vmatpush1.msra.mxu0 %v481_v29 }
  0x30   : > { %533 = vmatmul.mubr.f32.gmra.mxu1 %v2633_v11  ;;  %618 = vmatmul.mubr.f32.gmra.mxu0 %v422_v13 }
  0x31   : > { %623 = vmatprep.mubr.f32.mxu0 %v2505_v2  ;;  %698 = vmatprep.mubr.f32.mxu1 %v2505_v2 }
  0x34   : > { %626 = vmatmul.mubr.f32.gmra.mxu0 %v433_v14  ;;  %702 = vmatmul.mubr.f32.vlgmr.msra.gmra.mxu1 %v412_v16 }
  0x35   : > { %707 = vmatprep.mubr.f32.mxu1 %v2505_v2  ;;  %796 = vmatprep.mubr.f32.mxu0 %v2505_v2 }
  0x36   : > { %851 = vmatpush1.msra.mxu1 %v375_v20  ;;  %v2378_v20 = vld [vmem:[%s3082_s7 + $0x8] sm:$0x3] }
  0x37   : > { %v1027_v31 = vrot.slane %v2378_v20, %v2724_v24 }
  0x38   : > { %711 = vmatmul.mubr.f32.gmra.mxu1 %v423_v17  ;;  %798 = vmatmul.mubr.f32.vlgmr.msra.gmra.mxu0 %v2625_v6  ;;  %v2717_v17 = vsub.s32 0, %v920_v9 }
  0x39   : > { %716 = vmatprep.mubr.f32.mxu1 %v2505_v2  ;;  %803 = vmatprep.mubr.f32.mxu0 %v2505_v2 }
  0x3a   : > { %v1023_v27 = vrot.slane %v2378_v20, %v2717_v17 }
  0x3c   : > { %720 = vmatmul.mubr.f32.gmra.mxu1 %v434_v23  ;;  %805 = vmatmul.mubr.f32.gmra.mxu0 %v2627_v7 }
  0x3d   : > { %810 = vmatprep.mubr.f32.mxu0 %v2505_v2  ;;  %884 = vmatprep.mubr.f32.mxu1 %v2505_v2 }
  0x40   : > { %812 = vmatmul.mubr.f32.gmra.mxu0 %v2633_v11  ;;  %886 = vmatmul.mubr.f32.vlgmr.msra.gmra.mxu1 %v2625_v6 }
  0x41   : > { %891 = vmatprep.mubr.f32.mxu1 %v2505_v2  ;;  %1243 = vmatprep.mubr.f32.mxu0 %v2505_v2 }
  0x44   : > { %893 = vmatmul.mubr.f32.gmra.mxu1 %v2627_v7 }
  0x45   : > { %898 = vmatprep.mubr.f32.mxu1 %v2505_v2 }
  0x48   : > { %900 = vmatmul.mubr.f32.gmra.mxu1 %v2633_v11 }
  0x49   : > { %1369 = vmatprep.mubr.f32.mxu1 %v2505_v2 }
  0x91   : > { %v324_v60 = vpop.permute.xlu0 %323 }
  0xe0   : > { %v2670_v38 = vpop.f32.mrf.mxu0 }
  0xe2   : > { %v2672_v39 = vpop.f32.mrf.mxu0 }
  0xe4   : > { %v2674_v40 = vpop.f32.mrf.mxu0 }
  0xe6   : > { %v2676_v41 = vpop.f32.mrf.mxu0 }
  0xe8   : > { %v438_v42 = vpop.f32.mrf.mxu0  ;;  %v2678_v43 = vpop.f32.mrf.mxu1 }
  0xe9   : > { %v439_v1 = vadd.f32 %v438_v42, %v324_v60  ;;  %v1742_v42 = vld [vmem:[%s3081_s6] sm:$0xff] }
  0xea   : > { %v440_v44 = vpop.f32.mrf.mxu0  ;;  %v2680_v45 = vpop.f32.mrf.mxu1 }
  0xeb   : > { %v441_v7 = vadd.f32 %v440_v44, %v324_v60  ;;  %v1743_v44 = vld [vmem:[%s3081_s6 + $0x8] sm:$0xff] }
  0xec   : > { %v2682_v46 = vpop.f32.mrf.mxu1  ;;  %v2684_v47 = vpop.f32.mrf.mxu0 }
  0xee   : > { %v2686_v48 = vpop.f32.mrf.mxu1  ;;  %v2688_v49 = vpop.f32.mrf.mxu0 }
  0xf0   : > { %v534_v50 = vpop.f32.mrf.mxu1  ;;  %v2690_v51 = vpop.f32.mrf.mxu0 }
  0xf1   : > { %v535_v8 = vadd.f32 %v534_v50, %v439_v1  ;;  %v2746_v50 = vand.u32 127, %v912_v3  ;;  %v2379_v1 = vld [vmem:[%s3082_s7 + $0xa] sm:$0x3] }
  0xf2   : > { %v536_v52 = vpop.f32.mrf.mxu1  ;;  %v2692_v53 = vpop.f32.mrf.mxu0 }
  0xf3   : > { %v537_v12 = vadd.f32 %v536_v52, %v441_v7  ;;  %v2381_v52 = vld [vmem:[%s3082_s7 + $0xe] sm:$0x3]  ;;  %vm1092_vm2 = vcmp.lt.s32.totalorder %v2746_v50, 112  ;;  %vm1038_vm3 = vcmp.lt.s32.totalorder %v2746_v50, 127  ;;  %vm1068_vm4 = vcmp.lt.s32.totalorder %v2746_v50, 113 }
  0xf4   : > { %v627_v54 = vpop.f32.mrf.mxu0  ;;  %v2694_v55 = vpop.f32.mrf.mxu1  ;;  %v1101_v60 = vrot.slane %v2381_v52, %v2717_v17  ;;  %vm1122_vm5 = vcmp.lt.s32.totalorder %v2746_v50, 111  ;;  %vm991_vm6 = vcmp.lt.s32.totalorder %v2746_v50, 1  ;;  %vm937_vm7 = vcmp.lt.s32.totalorder %v2746_v50, 16 }
  0xf5   : > { %v628_v13 = vadd.f32 %v627_v54, %v535_v8  ;;  %vm967_vm9 = vcmp.lt.s32.totalorder %v2746_v50, 15  ;;  %vm914_vm10 = vcmp.lt.s32.totalorder %v2746_v50, 17 }
  0xf6   : > { %v629_v56 = vpop.f32.mrf.mxu0  ;;  %v2696_v57 = vpop.f32.mrf.mxu1 }
  0xf7   : > { %v630_v15 = vadd.f32 %v629_v56, %v537_v12  ;;  %v1047_v12 = vrot.slane %v2379_v1, %v2717_v17 }
  0xf8   : > { %v2698_v58 = vpop.f32.mrf.mxu1  ;;  %v2700_v59 = vpop.f32.mrf.mxu0 }
  0xfa   : > { %v2702_v61 = vpop.f32.mrf.mxu1  ;;  %v2704_v62 = vpop.f32.mrf.mxu0 }
  0xfc   : > { %v721_v63 = vpop.f32.mrf.mxu1  ;;  %v2706_v0 = vpop.f32.mrf.mxu0 }
  0xfd   : > { %v722_v16 = vadd.f32 %v721_v63, %v628_v13  ;;  %v1105_v63 = vrot.slane %v2381_v52, %v2724_v24  ;;  %v1051_v13 = vrot.slane %v2379_v1, %v2724_v24 }
  0xfe   : > { %v723_v4 = vpop.f32.mrf.mxu1  ;;  %v2708_v5 = vpop.f32.mrf.mxu0 }
  0xff   : > { %v724_v21 = vadd.f32 %v723_v4, %v630_v15  ;;  %v2380_v15 = vld [vmem:[%s3082_s7 + $0xc] sm:$0x3] }
 0x100   : > { %v2710_v6 = vpop.f32.mrf.mxu1  ;;  %v813_v10 = vpop.f32.mrf.mxu0 }
 0x101   : > { %v814_v22 = vadd.f32 %v813_v10, %v722_v16 }
 0x102   : > { %v2713_v11 = vpop.f32.mrf.mxu1  ;;  %v815_v18 = vpop.f32.mrf.mxu0 }
 0x103   : > { %v816_v25 = vadd.f32 %v815_v18, %v724_v21 }
 0x104   : > { %v2715_v14 = vpop.f32.mrf.mxu1 }
 0x106   : > { %v2719_v19 = vpop.f32.mrf.mxu1 }
 0x108   : > { %v901_v23 = vpop.f32.mrf.mxu1 }
 0x109   : > { %v902_v26 = vadd.f32 %v901_v23, %v814_v22 }
 0x10a   : > { %v903_v28 = vpop.f32.mrf.mxu1 }
 0x10b   : > { %v906_v29 = vmax.f32 %v902_v26, 0.0  ;;  %v904_v30 = vadd.f32 %v903_v28, %v816_v25  ;;  %v2382_v25 = vld [vmem:[%s3082_s7 + $0x10] sm:$0x3]  ;;  %v1077_v28 = vrot.slane %v2380_v15, %v2717_v17 }
 0x10d   : > { %v907_v32 = vmax.f32 %v904_v30, 0.0  ;;  %1088 = vrot.lane.b32.xlu1 %v906_v29, %s2507_s19  ;;  %1118 = vrot.lane.b32.xlu0 %v906_v29, %s2508_s20  ;;  %v1030_v33 = vmul.f32 %v1023_v27, %v906_v29  ;;  %v2377_v30 = vld [vmem:[%s3082_s7 + $0x6] sm:$0x3] }
 0x10f   : > { %1032 = vst [vmem:[#allocation2 + $0x48] sm:$0xf] %v1030_v33  ;;  %v1031_v34 = vmul.f32 %v1027_v31, %v907_v32 }
 0x111   : > { %1034 = vrot.lane.b32.xlu1 %v906_v29, %s2509_s21  ;;  %1090 = vrot.lane.b32.xlu0 %v907_v32, %s2507_s19  ;;  %1033 = vst [vmem:[#allocation2 + $0x28] sm:$0xf] %v1031_v34  ;;  %s2515_s19 = smov [#allocation3]  }
 0x115   : > { %1064 = vrot.lane.b32.xlu1 %v906_v29, %s2510_s22  ;;  %1036 = vrot.lane.b32.xlu0 %v907_v32, %s2509_s21 }
 0x119   : > { %987 = vrot.lane.b32.xlu1 %v906_v29, %s2511_s23  ;;  %1066 = vrot.lane.b32.xlu0 %v907_v32, %s2510_s22  ;;  %s296_s22 = sand.u32 1, %s2495_s28  }
 0x11a   : > { %s3034_s18 = scalar_lea.sflag [#allocation4], %s296_s22 }
 0x11d   : > { %1120 = vrot.lane.b32.xlu1 %v907_v32, %s2508_s20  ;;  %989 = vrot.lane.b32.xlu0 %v907_v32, %s2511_s23  ;;  %s2372_s23 = sshll.u32 %s296_s22, 5  ;;  %s2447_s20 = sshll.u32 %s2515_s19, 4  ;;  %s2448_s20 = int_to_ptr.vmem [resolvable:$false] %s2447_s20 }
 0x11e   : > { %s2449_s21 = scalar_lea.vmem %s2448_s20, 1024 }
 0x121   : > { %933 = vrot.lane.b32.xlu1 %v906_v29, %s2512_s24  ;;  %935 = vrot.lane.b32.xlu0 %v907_v32, %s2512_s24 }
 0x125   : > { %963 = vrot.lane.b32.xlu1 %v906_v29, %s2513_s25  ;;  %965 = vrot.lane.b32.xlu0 %v907_v32, %s2513_s25  ;;  %s298_s25 = scalar_lea.vmem [#allocation3], %s2372_s23 }
 0x129   : > { %908 = vrot.lane.b32.xlu1 %v906_v29, %s2514_s26  ;;  %910 = vrot.lane.b32.xlu0 %v907_v32, %s2514_s26  ;;  %v1081_v29 = vrot.slane %v2380_v15, %v2724_v24  ;;  %s2306_s26 = sshll.u32 %s298_s25, 4  ;;  %s3025_s26 = int_to_ptr.vmem [resolvable:$true] %s2306_s26 }
 0x12a   : > { %s2443_s9 = scalar_lea.vmem %s3025_s26, 512  ;;  %p2450_p0 = scmp.lt.s32.totalorder %s3025_s26, %s2448_s20 }
 0x12b   : > { %p2444_p11 = scmp.ne.s32.totalorder %s3025_s26, %s2443_s9  ;;  %p2451_p1 = scmp.lt.s32.totalorder %s2449_s21, %s2443_s9 }
 0x12d   : > { %1156 = vperm.xlu1 %2441, %v1153_v35   ;;  %313 = vperm.xlu0 %2440, %v308_v36   ;;  %v1131_v35 = vrot.slane %v2382_v25, %v2717_v17  ;;  %p2445_p12 = pnand %p2444_p11, %p2600_p5  ;;  %p2452_p2 = por %p2451_p1, %p2450_p0 }
 0x12f   : > { %p2446_p13 = pneg %p2445_p12 }
 0x131   : > { %318 = vperm.xlu1 %2441, %v309_v37   ;;  %1746 = vperm.xlu0 %2440, %v1742_v42   ;;  %v1135_v42 = vrot.slane %v2382_v25, %v2724_v24  ;;  %p2453_p3 = pnand %p2452_p2, %p2446_p13 }
 0x135   : > { %1751 = vperm.xlu1 %2441, %v1743_v44   ;;  %v2375_v44 = vld [vmem:[%s3082_s7 + $0x2] sm:$0x3] }
 0x17f   : > { %v1089_v54 = vpop.permute.xlu1 %1088  ;;  %v1119_v56 = vpop.permute.xlu0 %1118 }
 0x183   : > { %v1035_v4 = vpop.permute.xlu1 %1034  ;;  %v1091_v7 = vpop.permute.xlu0 %1090 }
 0x184   : > { %v1093_v3 = vsel %vm1092_vm2, %v1089_v54, %v1091_v7  ;;  %v1094_v8 = vsel %vm1092_vm2, %v1091_v7, %v1089_v54  ;;  %v946_v7 = vrot.slane %v2375_v44, %v2717_v17 }
 0x185   : > { %v1108_v9 = vmul.f32 %v1101_v60, %v1093_v3  ;;  %v1109_v10 = vmul.f32 %v1105_v63, %v1094_v8  ;;  %v1000_v60 = vrot.slane %v2377_v30, %v2717_v17  ;;  %v1004_v63 = vrot.slane %v2377_v30, %v2724_v24 }
 0x186   : > { %v950_v3 = vrot.slane %v2375_v44, %v2724_v24 }
 0x187   : > { %v1112_v16 = vrot.slane %v1108_v9, 4  ;;  %v1113_v18 = vrot.slane %v1109_v10, 4  ;;  %v1065_v20 = vpop.permute.xlu1 %1064  ;;  %v1037_v21 = vpop.permute.xlu0 %1036 }
 0x188   : > { %v1039_v22 = vsel %vm1038_vm3, %v1035_v4, %v1037_v21  ;;  %v1040_v23 = vsel %vm1038_vm3, %v1037_v21, %v1035_v4  ;;  %v2376_v21 = vld [vmem:[%s3082_s7 + $0x4] sm:$0x3] }
 0x189   : > { %1116 = vst [vmem:[#allocation2 + $0x8] sm:$0xf0] %v1112_v16  ;;  %1117 = vst [vmem:[#allocation2 + $0x20] sm:$0xf0] %v1113_v18  ;;  %v1054_v26 = vmul.f32 %v1047_v12, %v1039_v22  ;;  %v1055_v27 = vmul.f32 %v1051_v13, %v1040_v23  ;;  %v1142_v13 = vld [vmem:[%s3078_s3] sm:$0xf] }
 0x18b   : > { %v1058_v31 = vrot.slane %v1054_v26, 4  ;;  %v1059_v32 = vrot.slane %v1055_v27, 4  ;;  %v988_v33 = vpop.permute.xlu1 %987  ;;  %v1067_v34 = vpop.permute.xlu0 %1066  ;;  %v1161_v26 = vsel %vm1159_vm8, %v1142_v13, 0 }
 0x18c   : > { %v1069_v36 = vsel %vm1068_vm4, %v1065_v20, %v1067_v34  ;;  %v1070_v37 = vsel %vm1068_vm4, %v1067_v34, %v1065_v20  ;;  %v917_v34 = vld [vmem:[%s3082_s7] sm:$0x3]  ;;  %v2815_v44 = vand.u32 4294901760, %v1161_v26 }
 0x18d   : > { %1062 = vst [vmem:[#allocation2 + $0x48] sm:$0xf0] %v1058_v31  ;;  %1063 = vst [vmem:[#allocation2 + $0x28] sm:$0xf0] %v1059_v32  ;;  %v1084_v52 = vmul.f32 %v1077_v28, %v1069_v36  ;;  %v1085_v54 = vmul.f32 %v1081_v29, %v1070_v37  ;;  %v976_v32 = vrot.slane %v2376_v21, %v2717_v17 }
 0x18f   : > { %1086 = vst [vmem:[#allocation2 + $0x8] sm:$0xf] %v1084_v52  ;;  %1087 = vst [vmem:[#allocation2 + $0x20] sm:$0xf] %v1085_v54  ;;  %v1121_v1 = vpop.permute.xlu1 %1120  ;;  %v990_v4 = vpop.permute.xlu0 %989 }
 0x190   : > { %v1123_v8 = vsel %vm1122_vm5, %v1119_v56, %v1121_v1  ;;  %v1124_v9 = vsel %vm1122_vm5, %v1121_v1, %v1119_v56  ;;  %v992_v10 = vsel %vm991_vm6, %v988_v33, %v990_v4  ;;  %v993_v12 = vsel %vm991_vm6, %v990_v4, %v988_v33 }
 0x191   : > { %v1138_v15 = vmul.f32 %v1131_v35, %v1123_v8  ;;  %v1139_v16 = vmul.f32 %v1135_v42, %v1124_v9  ;;  %v1007_v18 = vmul.f32 %v1000_v60, %v993_v12  ;;  %v1008_v20 = vmul.f32 %v1004_v63, %v992_v10 }
 0x192   : > { %v980_v33 = vrot.slane %v2376_v21, %v2724_v24  ;;  %v922_v8 = vrot.slane %v917_v34, %v2717_v17  ;;  %v926_v12 = vrot.slane %v917_v34, %v2724_v24 }
 0x193   : > { %1140 = vst [vmem:[#allocation2 + $0x40] sm:$0xf] %v1138_v15  ;;  %1141 = vst [vmem:[#allocation2 + $0x38] sm:$0xf] %v1139_v16  ;;  %v1011_v56 = vrot.slane %v1007_v18, 4  ;;  %v1012_v22 = vrot.slane %v1008_v20, 4  ;;  %v934_v23 = vpop.permute.xlu1 %933  ;;  %v936_v25 = vpop.permute.xlu0 %935 }
 0x194   : > { %v938_v27 = vsel %vm937_vm7, %v934_v23, %v936_v25  ;;  %v939_v28 = vsel %vm937_vm7, %v936_v25, %v934_v23  ;;  %v1148_v29 = vld [vmem:[#allocation2 + $0x28] sm:$0xff]  ;;  %v2842_v23 = vsub.f32 %v1161_v26, %v2815_v44 }
 0x195   : > { %1015 = vst [vmem:[#allocation2 + $0x18] sm:$0xf0] %v1011_v56  ;;  %1016 = vst [vmem:[#allocation2 + $0x10] sm:$0xf0] %v1012_v22  ;;  %v953_v30 = vmul.f32 %v946_v7, %v939_v28  ;;  %v954_v31 = vmul.f32 %v950_v3, %v938_v27  ;;  %v2813_v37 = vand.u32 4294901760, %v1148_v29  ;;  %v1147_v42 = vld [vmem:[#allocation2 + $0x48] sm:$0xff] }
 0x196   : > { %v1150_v35 = vld [vmem:[#allocation2 + $0x20] sm:$0xff]  ;;  %v1149_v36 = vld [vmem:[#allocation2 + $0x8] sm:$0xff]  ;;  %v2828_v13 = vand.u32 4294901760, %v1147_v42 }
 0x197   : > { %v957_v52 = vrot.slane %v953_v30, 4  ;;  %v958_v54 = vrot.slane %v954_v31, 4  ;;  %v964_v60 = vpop.permute.xlu1 %963  ;;  %v966_v63 = vpop.permute.xlu0 %965  ;;  %v2817_v1 = vand.u32 4294901760, %v1150_v35  ;;  %v2819_v4 = vand.u32 4294901760, %v1149_v36 }
 0x198   : > { %v968_v7 = vsel %vm967_vm9, %v964_v60, %v966_v63  ;;  %v969_v3 = vsel %vm967_vm9, %v966_v63, %v964_v60  ;;  %v2839_v24 = vsub.f32 %v1148_v29, %v2813_v37 }
 0x199   : > { %961 = vst [vmem:[#allocation2 + $0x30] sm:$0xf0] %v957_v52  ;;  %962 = vst [vmem:[#allocation2] sm:$0xf0] %v958_v54  ;;  %v983_v9 = vmul.f32 %v976_v32, %v969_v3  ;;  %v984_v10 = vmul.f32 %v980_v33, %v968_v7  ;;  %v2831_v18 = vsub.f32 %v1149_v36, %v2819_v4  ;;  %v3084_v52 = vand.u32 4294901760, %v2842_v23 }
 0x19a   : > { %v1152_v15 = vld [vmem:[#allocation2 + $0x38] sm:$0xf]  ;;  %v1151_v16 = vld [vmem:[#allocation2 + $0x40] sm:$0xf]  ;;  %v2834_v20 = vsub.f32 %v1150_v35, %v2817_v1  ;;  %v2853_v33 = vsub.f32 %v1147_v42, %v2828_v13  ;;  %v3085_v42 = vand.u32 4294901760, %v2839_v24 }
 0x19b   : > { %985 = vst [vmem:[#allocation2 + $0x18] sm:$0xf] %v983_v9  ;;  %986 = vst [vmem:[#allocation2 + $0x10] sm:$0xf] %v984_v10  ;;  %v909_v21 = vpop.permute.xlu1 %908  ;;  %v911_v17 = vpop.permute.xlu0 %910  ;;  %v1167_v56 = vsel %vm338_vm1, %v1152_v15, 0  ;;  %v1164_v22 = vsel %vm338_vm1, %v1151_v16, 0 }
 0x19c   : > { %v915_v25 = vsel %vm914_vm10, %v909_v21, %v911_v17  ;;  %v916_v27 = vsel %vm914_vm10, %v911_v17, %v909_v21  ;;  %v2848_v28 = vand.u32 4294901760, %v1167_v56  ;;  %v2850_v30 = vand.u32 4294901760, %v1164_v22 }
 0x19d   : > { %v929_v31 = vmul.f32 %v922_v8, %v916_v27  ;;  %v930_v32 = vmul.f32 %v926_v12, %v915_v25  ;;  %v1291_v50 = vand.u32 4294901760, %v2834_v20  ;;  %v3087_v34 = vand.u32 4294901760, %v2831_v18 }
 0x19e   : > { %1192 = vmatprep.subr.mxu0 %v2848_v28  ;;  %v2857_v26 = vsub.f32 %v1164_v22, %v2850_v30  ;;  %v2860_v29 = vsub.f32 %v1167_v56, %v2848_v28  ;;  %v3086_v54 = vand.u32 4294901760, %v2853_v33  ;;  %v1304_v21 = vsub.f32 %v2839_v24, %v3085_v42 }
 0x19f   : > { %931 = vst [vmem:[#allocation2 + $0x30] sm:$0xf] %v929_v31  ;;  %932 = vst [vmem:[#allocation2] sm:$0xf] %v930_v32  ;;  %1194 = vmatpush1.msra.mxu0 %v2850_v30  ;;  %v1292_v8 = vsub.f32 %v2834_v20, %v1291_v50  ;;  %v1298_v9 = vsub.f32 %v2831_v18, %v3087_v34  ;;  %v1247_v17 = vsub.f32 %v2842_v23, %v3084_v52 }
 0x1a0   : > { %1196 = vmatprep.subr.mxu0 %v2817_v1  ;;  %v1279_v35 = vand.u32 4294901760, %v2860_v29  ;;  %v1285_v36 = vand.u32 4294901760, %v2857_v26  ;;  %v1310_v22 = vsub.f32 %v2853_v33, %v3086_v54  ;;  %v1305_v54 = vand.u32 4294901760, %v1304_v21 }
 0x1a1   : > { %1198 = vmatpush1.msra.mxu0 %v2819_v4  ;;  %v1293_v27 = vand.u32 4294901760, %v1292_v8  ;;  %v1299_v32 = vand.u32 4294901760, %v1298_v9 }
 0x1a2   : > { %1200 = vmatprep.subr.mxu0 %v2813_v37  ;;  %v1146_v60 = vld [vmem:[#allocation2 + $0x10] sm:$0xff]  ;;  %v1145_v63 = vld [vmem:[#allocation2 + $0x18] sm:$0xff]  ;;  %v1280_v7 = vsub.f32 %v2860_v29, %v1279_v35  ;;  %v1286_v3 = vsub.f32 %v2857_v26, %v1285_v36 }
 0x1a3   : > { %1202 = vmatpush1.msra.mxu0 %v2828_v13  ;;  %v2886_v10 = vand.u32 4294901760, %v1146_v60  ;;  %v2888_v12 = vand.u32 4294901760, %v1145_v63 }
 0x1a4   : > { %v1281_v15 = vand.u32 4294901760, %v1280_v7  ;;  %v1287_v16 = vand.u32 4294901760, %v1286_v3 }
 0x1a5   : > { %1204 = vmatprep.subr.mxu0 %v2886_v10  ;;  %v2898_v56 = vsub.f32 %v1145_v63, %v2888_v12  ;;  %v2904_v25 = vsub.f32 %v1146_v60, %v2886_v10  ;;  %v1248_v60 = vand.u32 4294901760, %v1247_v17 }
 0x1a6   : > { %1206 = vmatpush1.msra.mxu0 %v2888_v12  ;;  %1282 = vmatprep.subr.mxu1 %v1281_v15  ;;  %v1144_v31 = vld [vmem:[#allocation2] sm:$0xff]  ;;  %v1143_v7 = vld [vmem:[#allocation2 + $0x30] sm:$0xff]  ;;  %v1311_v15 = vand.u32 4294901760, %v1310_v22 }
 0x1a7   : > { %1288 = vmatpush1.msra.mxu1 %v1287_v16  ;;  %v2907_v3 = vand.u32 4294901760, %v1144_v31  ;;  %v2909_v52 = vand.u32 4294901760, %v1143_v7  ;;  %v1315_v63 = vand.u32 4294901760, %v2904_v25  ;;  %v1321_v42 = vand.u32 4294901760, %v2898_v56 }
 0x1a8   : > { %1294 = vmatprep.subr.mxu1 %v1293_v27 }
 0x1a9   : > { %1208 = vmatprep.subr.mxu0 %v2907_v3  ;;  %1300 = vmatpush1.msra.mxu1 %v1299_v32  ;;  %v1332_v8 = vsub.f32 %v1143_v7, %v2909_v52  ;;  %v1316_v9 = vsub.f32 %v2904_v25, %v1315_v63  ;;  %v1322_v16 = vsub.f32 %v2898_v56, %v1321_v42 }
 0x1aa   : > { %1210 = vmatpush1.msra.mxu0 %v2909_v52  ;;  %1306 = vmatprep.subr.mxu1 %v1305_v54  ;;  %v1326_v34 = vsub.f32 %v1144_v31, %v2907_v3 }
 0x1ab   : > { %1312 = vmatpush1.msra.mxu1 %v1311_v15  ;;  %1401 = vmatprep.subr.mxu0 %v2860_v29  ;;  %v1333_v21 = vand.u32 4294901760, %v1332_v8  ;;  %v1317_v17 = vand.u32 4294901760, %v1316_v9  ;;  %v1323_v27 = vand.u32 4294901760, %v1322_v16  ;;  %v3091_v29 = vand.u32 4294901760, %v2839_v24 }
 0x1ac   : > { %1249 = vmatmul.mubr.f32.vlgmr.msra.gmra.mxu0 %v1248_v60  ;;  %v1327_v32 = vand.u32 4294901760, %v1326_v34 }
 0x1ad   : > { %1404 = vmatpush1.msra.mxu0 %v2857_v26  ;;  %1318 = vmatprep.subr.mxu1 %v1317_v17  ;;  %v1334_v22 = vsub.f32 %v1332_v8, %v1333_v21  ;;  %v3092_v26 = vand.u32 4294901760, %v2853_v33 }
 0x1ae   : > { %1407 = vmatprep.subr.mxu0 %v2834_v20  ;;  %v1328_v54 = vsub.f32 %v1326_v34, %v1327_v32  ;;  %1324 = vmatpush1.msra.mxu1 %v1323_v27 }
 0x1af   : > { %1410 = vmatpush1.msra.mxu0 %v2831_v18  ;;  %v1335_v31 = vand.u32 4294901760, %v1334_v22  ;;  %1461 = vmatprep.mubr.f32.mxu0 %v2505_v2 }
 0x1b0   : > { %v1329_v7 = vand.u32 4294901760, %v1328_v54  ;;  %1413 = vmatprep.subr.mxu0 %v2839_v24 }
 0x1b1   : > { %1416 = vmatpush1.msra.mxu0 %v2853_v33 }
 0x1b2   : > { %1330 = vmatprep.subr.mxu1 %v1329_v7  ;;  %1419 = vmatprep.subr.mxu0 %v2904_v25 }
 0x1b3   : > { %1336 = vmatpush1.msra.mxu1 %v1335_v31  ;;  %1422 = vmatpush1.msra.mxu0 %v2898_v56 }
 0x1b4   : > { %1371 = vmatmul.mubr.f32.vlgmr.msra.gmra.mxu1 %v2815_v44  ;;  %1425 = vmatprep.subr.mxu0 %v1326_v34  ;;  %v3090_v34 = vand.u32 4294901760, %v2831_v18  ;;  %v3093_v18 = vand.u32 4294901760, %v2842_v23 }
 0x1b5   : > { %1493 = vmatprep.subr.mxu1 %v2848_v28  ;;  %1428 = vmatpush1.msra.mxu0 %v1332_v8 }
 0x1b6   : > { %1495 = vmatpush1.msra.mxu1 %v2850_v30  ;;  %1464 = vmatmul.mubr.f32.vlgmr.msra.gmra.mxu0 %v2842_v23 }
 0x1b7   : > { %1497 = vmatprep.subr.mxu1 %v2817_v1  ;;  %1579 = vmatprep.subr.mxu0 %v1279_v35 }
 0x1b8   : > { %1499 = vmatpush1.msra.mxu1 %v2819_v4  ;;  %1583 = vmatpush1.msra.mxu0 %v1285_v36 }
 0x1b9   : > { %1501 = vmatprep.subr.mxu1 %v2813_v37  ;;  %1587 = vmatprep.subr.mxu0 %v1291_v50 }
 0x1ba   : > { %1503 = vmatpush1.msra.mxu1 %v2828_v13  ;;  %1591 = vmatpush1.msra.mxu0 %v3090_v34 }
 0x1bb   : > { %1505 = vmatprep.subr.mxu1 %v2886_v10  ;;  %1595 = vmatprep.subr.mxu0 %v3091_v29 }
 0x1bc   : > { %1507 = vmatpush1.msra.mxu1 %v2888_v12  ;;  %1599 = vmatpush1.msra.mxu0 %v3092_v26 }
 0x1bd   : > { %1509 = vmatprep.subr.mxu1 %v2907_v3  ;;  %1603 = vmatprep.subr.mxu0 %v1315_v63 }
 0x1be   : > { %1511 = vmatpush1.msra.mxu1 %v2909_v52  ;;  %1544 = vmatprep.mubr.f32.mxu1 %v2505_v2 }
 0x1bf   : > { %1607 = vmatpush1.msra.mxu0 %v1321_v42  ;;  %1548 = vmatmul.mubr.f32.vlgmr.msra.gmra.mxu1 %v3093_v18 }
 0x1c0   : > { %1611 = vmatprep.subr.mxu0 %v1327_v32  ;;  %1679 = vmatprep.subr.mxu1 %v2848_v28 }
 0x1c1   : > { %1615 = vmatpush1.msra.mxu0 %v1333_v21  ;;  %1648 = vmatprep.mubr.f32.mxu0 %v2505_v2 }
 0x1c2   : > { %1681 = vmatpush1.msra.mxu1 %v2850_v30  ;;  %1650 = vmatmul.mubr.f32.vlgmr.msra.gmra.mxu0 %v2815_v44 }
 0x1c3   : > { %1683 = vmatprep.subr.mxu1 %v2817_v1  ;;  %1730 = vmatprep.mubr.f32.mxu1 %v2505_v2 }
 0x1c4   : > { %1685 = vmatpush1.msra.mxu1 %v2819_v4  ;;  %1832 = vmatprep.mubr.f32.mxu0 %v2505_v2  ;;  %v1157_v4 = vpop.permute.xlu1 %1156 }
 0x1c5   : > { %1687 = vmatprep.subr.mxu1 %v2813_v37 }
 0x1c6   : > { %1689 = vmatpush1.msra.mxu1 %v2828_v13  ;;  %v1740_v13 = vld [vmem:[%s3080_s5] sm:$0xff] }
 0x1c7   : > { %1691 = vmatprep.subr.mxu1 %v2886_v10  ;;  %v1755_v50 = vsel %vm328_vm0, %v1740_v13, 0 }
 0x1c8   : > { %1693 = vmatpush1.msra.mxu1 %v2888_v12 }
 0x1c9   : > { %1695 = vmatprep.subr.mxu1 %v2907_v3 }
 0x1ca   : > { %1697 = vmatpush1.msra.mxu1 %v2909_v52  ;;  %v2978_v52 = vand.u32 4294901760, %v1755_v50 }
 0x1cb   : > { %1732 = vmatmul.mubr.f32.vlgmr.msra.gmra.mxu1 %v2815_v44  ;;  %v1741_v44 = vld [vmem:[%s3080_s5 + $0x8] sm:$0xff] }
 0x1cc   : > { %1929 = vmatprep.mubr.f32.mxu1 %v2505_v2  ;;  %v1758_v12 = vsel %vm328_vm0, %v1741_v44, 0  ;;  %v1834_v60 = vsub.f32 %v1755_v50, %v2978_v52 }
 0x1cd   : > { %v1844_v8 = vand.u32 4294901760, %v1758_v12 }
 0x1ce   : > { %v1835_v17 = vand.u32 4294901760, %v1834_v60 }
 0x1cf   : > { %v1845_v27 = vsub.f32 %v1758_v12, %v1844_v8 }
 0x1d0   : > { %v1836_v34 = vsub.f32 %v1834_v60, %v1835_v17 }
 0x1d1   : > { %v1846_v29 = vand.u32 4294901760, %v1845_v27 }
 0x1d3   : > { %v1847_v13 = vsub.f32 %v1845_v27, %v1846_v29 }
 0x26c   : > { %v1250_v1 = vpop.f32.mrf.mxu0 }
 0x26d   : > { %v1251_v24 = vadd.f32 %v1250_v1, %v1157_v4 }
 0x26e   : > { %v1252_v20 = vpop.f32.mrf.mxu0 }
 0x26f   : > { %v1253_v23 = vadd.f32 %v1252_v20, %v1157_v4 }
 0x274   : > { %v1372_v37 = vpop.f32.mrf.mxu1 }
 0x275   : > { %v1373_v33 = vadd.f32 %v1372_v37, %v1251_v24  ;;  %v1837_v24 = vand.u32 4294901760, %v1836_v34 }
 0x276   : > { %v1374_v28 = vpop.f32.mrf.mxu1  ;;  %v1465_v30 = vpop.f32.mrf.mxu0 }
 0x277   : > { %v1375_v36 = vadd.f32 %v1374_v28, %v1253_v23  ;;  %v1466_v10 = vadd.f32 %v1465_v30, %v1373_v33  ;;  %v1848_v33 = vand.u32 4294901760, %v1847_v13 }
 0x278   : > { %v1467_v42 = vpop.f32.mrf.mxu0 }
 0x279   : > { %v1468_v3 = vadd.f32 %v1467_v42, %v1375_v36 }
 0x27f   : > { %v1549_v35 = vpop.f32.mrf.mxu1 }
 0x280   : > { %v1550_v63 = vadd.f32 %v1549_v35, %v1466_v10  ;;  %v314_v10 = vpop.permute.xlu0 %313 }
 0x281   : > { %v1551_v56 = vpop.f32.mrf.mxu1 }
 0x282   : > { %v1651_v25 = vpop.f32.mrf.mxu0  ;;  %v1552_v15 = vadd.f32 %v1551_v56, %v1468_v3  ;;  %v319_v3 = vpop.permute.xlu1 %318 }
 0x283   : > { %v1652_v16 = vadd.f32 %v1651_v25, %v1550_v63  ;;  %v417_v25 = vadd.f32 %v2670_v38, %v314_v10  ;;  %v419_v63 = vadd.f32 %v2672_v39, %v314_v10 }
 0x284   : > { %v1653_v9 = vpop.f32.mrf.mxu0 }
 0x285   : > { %v1654_v32 = vadd.f32 %v1653_v9, %v1552_v15  ;;  %v428_v15 = vadd.f32 %v2674_v40, %v319_v3 }
 0x287   : > { %v528_v38 = vadd.f32 %v2682_v46, %v428_v15 }
 0x28b   : > { %v1733_v21 = vpop.f32.mrf.mxu1 }
 0x28c   : > { %v1734_v54 = vadd.f32 %v1733_v21, %v1652_v16  ;;  %v521_v21 = vadd.f32 %v2678_v43, %v417_v25 }
 0x28d   : > { %v1735_v22 = vpop.f32.mrf.mxu1 }
 0x28e   : > { %v1738_v7 = vmax.f32 %v1734_v54, 0.0  ;;  %v1736_v31 = vadd.f32 %v1735_v22, %v1654_v32  ;;  %v612_v39 = vadd.f32 %v2684_v47, %v521_v21 }
 0x290   : > { %v1761_v26 = vsel %vm338_vm1, %v1738_v7, 0  ;;  %v1739_v18 = vmax.f32 %v1736_v31, 0.0  ;;  %v1752_v7 = vpop.permute.xlu1 %1751  ;;  %v704_v46 = vadd.f32 %v2694_v55, %v612_v39 }
 0x291   : > { %v1798_v1 = vand.u32 4294901760, %v1761_v26 }
 0x292   : > { %v1764_v4 = vsel %vm338_vm1, %v1739_v18, 0  ;;  %v800_v55 = vadd.f32 %v2700_v59, %v704_v46 }
 0x293   : > { %v1892_v20 = vsub.f32 %v1761_v26, %v1798_v1  ;;  %v1796_v37 = vand.u32 4294901760, %v1764_v4 }
 0x295   : > { %v1893_v23 = vand.u32 4294901760, %v1892_v20  ;;  %1797 = vmatprep.subr.mxu0 %v1796_v37  ;;  %v1886_v28 = vsub.f32 %v1764_v4, %v1796_v37 }
 0x296   : > { %1799 = vmatpush1.msra.mxu0 %v1798_v1 }
 0x297   : > { %1838 = vmatmul.mubr.f32.vlgmr.msra.gmra.mxu0 %v1837_v24  ;;  %1976 = vmatprep.subr.mxu0 %v1886_v28  ;;  %v1887_v30 = vand.u32 4294901760, %v1886_v28  ;;  %v1894_v50 = vsub.f32 %v1892_v20, %v1893_v23 }
 0x298   : > { %1979 = vmatpush1.msra.mxu0 %v1892_v20  ;;  %1843 = vmatprep.mubr.f32.mxu0 %v2505_v2 }
 0x299   : > { %2147 = vmatprep.subr.mxu0 %v1887_v30  ;;  %v1888_v35 = vsub.f32 %v1886_v28, %v1887_v30  ;;  %v1895_v36 = vand.u32 4294901760, %v1894_v50 }
 0x29b   : > { %1849 = vmatmul.mubr.f32.gmra.mxu0 %v1848_v33  ;;  %v1889_v44 = vand.u32 4294901760, %v1888_v35 }
 0x29c   : > { %2012 = vmatprep.mubr.f32.mxu0 %v2505_v2 }
 0x29d   : > { %1890 = vmatprep.subr.mxu1 %v1889_v44 }
 0x29e   : > { %1896 = vmatpush1.msra.mxu1 %v1895_v36 }
 0x29f   : > { %1931 = vmatmul.mubr.f32.vlgmr.msra.gmra.mxu1 %v2978_v52  ;;  %2015 = vmatmul.mubr.f32.vlgmr.msra.gmra.mxu0 %v1834_v60 }
 0x2a0   : > { %2060 = vmatprep.subr.mxu1 %v1796_v37  ;;  %2151 = vmatpush1.msra.mxu0 %v1893_v23 }
 0x2a1   : > { %2062 = vmatpush1.msra.mxu1 %v1798_v1  ;;  %1936 = vmatprep.mubr.f32.mxu1 %v2505_v2 }
 0x2a2   : > { %2230 = vmatprep.subr.mxu1 %v1796_v37  ;;  %2020 = vmatprep.mubr.f32.mxu0 %v2505_v2 }
 0x2a3   : > { %1938 = vmatmul.mubr.f32.gmra.mxu1 %v1844_v8  ;;  %2023 = vmatmul.mubr.f32.gmra.mxu0 %v1845_v27  ;;  %v430_v27 = vadd.f32 %v2676_v41, %v319_v3  ;;  %v620_v41 = vadd.f32 %v2690_v51, %v528_v38 }
 0x2a4   : > { %2095 = vmatprep.mubr.f32.mxu1 %v2505_v2  ;;  %2184 = vmatprep.mubr.f32.mxu0 %v2505_v2 }
 0x2a5   : > { %v713_v33 = vadd.f32 %v2698_v58, %v620_v41 }
 0x2a7   : > { %2099 = vmatmul.mubr.f32.vlgmr.msra.gmra.mxu1 %v1835_v17  ;;  %2186 = vmatmul.mubr.f32.vlgmr.msra.gmra.mxu0 %v2978_v52  ;;  %v807_v25 = vadd.f32 %v2706_v0, %v713_v33 }
 0x2a8   : > { %2232 = vmatpush1.msra.mxu1 %v1798_v1  ;;  %2104 = vmatprep.mubr.f32.mxu1 %v2505_v2 }
 0x2a9   : > { %2191 = vmatprep.mubr.f32.mxu0 %v2505_v2 }
 0x2ab   : > { %2108 = vmatmul.mubr.f32.gmra.mxu1 %v1846_v29  ;;  %2193 = vmatmul.mubr.f32.gmra.mxu0 %v1844_v8 }
 0x2ac   : > { %2265 = vmatprep.mubr.f32.mxu1 %v2505_v2 }
 0x2af   : > { %2267 = vmatmul.mubr.f32.vlgmr.msra.gmra.mxu1 %v2978_v52  ;;  %v1747_v52 = vpop.permute.xlu0 %1746 }
 0x2b0   : > { %2272 = vmatprep.mubr.f32.mxu1 %v2505_v2  ;;  %v523_v2 = vadd.f32 %v2680_v45, %v419_v63  ;;  %v530_v45 = vadd.f32 %v2686_v48, %v430_v27  ;;  %v888_v63 = vadd.f32 %v2710_v6, %v800_v55 }
 0x2b2   : > { %v614_v34 = vadd.f32 %v2688_v49, %v523_v2  ;;  %v622_v23 = vadd.f32 %v2692_v53, %v530_v45 }
 0x2b3   : > { %2274 = vmatmul.mubr.f32.gmra.mxu1 %v1844_v8 }
 0x2b4   : > { %v706_v24 = vadd.f32 %v2696_v57, %v614_v34 }
 0x2b6   : > { %v802_v57 = vadd.f32 %v2704_v62, %v706_v24 }
 0x2b8   : > { %v890_v15 = vadd.f32 %v2713_v11, %v802_v57 }
 0x357   : > { %v1839_v42 = vpop.f32.mrf.mxu0 }
 0x358   : > { %v1840_v32 = vadd.f32 %v1839_v42, %v1747_v52  ;;  %v715_v42 = vadd.f32 %v2702_v61, %v622_v23 }
 0x359   : > { %v1841_v12 = vpop.f32.mrf.mxu0 }
 0x35a   : > { %v1842_v40 = vadd.f32 %v1841_v12, %v1747_v52  ;;  %v809_v21 = vadd.f32 %v2708_v5, %v715_v42  ;;  %v895_v52 = vadd.f32 %v2715_v14, %v807_v25 }
 0x35b   : > { %v1850_v56 = vpop.f32.mrf.mxu0 }
 0x35c   : > { %v1851_v26 = vadd.f32 %v1850_v56, %v1752_v7  ;;  %v897_v38 = vadd.f32 %v2719_v19, %v809_v21 }
 0x35d   : > { %v1852_v60 = vpop.f32.mrf.mxu0 }
 0x35e   : > { %v1853_v20 = vadd.f32 %v1852_v60, %v1752_v7 }
 0x35f   : > { %v1932_v9 = vpop.f32.mrf.mxu1  ;;  %v2016_v16 = vpop.f32.mrf.mxu0 }
 0x360   : > { %v1933_v31 = vadd.f32 %v1932_v9, %v1840_v32 }
 0x361   : > { %v1934_v8 = vpop.f32.mrf.mxu1  ;;  %v2018_v17 = vpop.f32.mrf.mxu0 }
 0x362   : > { %v1935_v18 = vadd.f32 %v1934_v8, %v1842_v40  ;;  %v2017_v37 = vadd.f32 %v2016_v16, %v1933_v31 }
 0x363   : > { %v1939_v54 = vpop.f32.mrf.mxu1  ;;  %v2024_v22 = vpop.f32.mrf.mxu0 }
 0x364   : > { %v1940_v47 = vadd.f32 %v1939_v54, %v1851_v26  ;;  %v2019_v28 = vadd.f32 %v2018_v17, %v1935_v18 }
 0x365   : > { %v1941_v43 = vpop.f32.mrf.mxu1  ;;  %v2026_v29 = vpop.f32.mrf.mxu0 }
 0x366   : > { %v1942_v48 = vadd.f32 %v1941_v43, %v1853_v20  ;;  %v2025_v50 = vadd.f32 %v2024_v22, %v1940_v47 }
 0x367   : > { %v2100_v1 = vpop.f32.mrf.mxu1  ;;  %v2187_v4 = vpop.f32.mrf.mxu0 }
 0x368   : > { %v2101_v30 = vadd.f32 %v2100_v1, %v2017_v37  ;;  %v2027_v10 = vadd.f32 %v2026_v29, %v1942_v48 }
 0x369   : > { %v2102_v13 = vpop.f32.mrf.mxu1  ;;  %v2189_v49 = vpop.f32.mrf.mxu0 }
 0x36a   : > { %v2103_v35 = vadd.f32 %v2102_v13, %v2019_v28  ;;  %v2188_v53 = vadd.f32 %v2187_v4, %v2101_v30 }
 0x36b   : > { %v2109_v51 = vpop.f32.mrf.mxu1  ;;  %v2194_v36 = vpop.f32.mrf.mxu0 }
 0x36c   : > { %v2110_v12 = vadd.f32 %v2109_v51, %v2025_v50  ;;  %v2190_v58 = vadd.f32 %v2189_v49, %v2103_v35 }
 0x36d   : > { %v2111_v44 = vpop.f32.mrf.mxu1  ;;  %v2196_v60 = vpop.f32.mrf.mxu0 }
 0x36e   : > { %v2112_v3 = vadd.f32 %v2111_v44, %v2027_v10  ;;  %v2195_v62 = vadd.f32 %v2194_v36, %v2110_v12 }
 0x36f   : > { %v2268_v56 = vpop.f32.mrf.mxu1 }
 0x370   : > { %v2269_v59 = vadd.f32 %v2268_v56, %v2188_v53  ;;  %v2197_v2 = vadd.f32 %v2196_v60, %v2112_v3 }
 0x371   : > { %v2270_v9 = vpop.f32.mrf.mxu1 }
 0x372   : > { %v2280_v16 = vadd.f32 %v2269_v59, %v888_v63  ;;  %v2271_v61 = vadd.f32 %v2270_v9, %v2190_v58 }
 0x373   : > { %v2275_v0 = vpop.f32.mrf.mxu1 }
 0x374   : > { %v2284_v8 = vmax.f32 %v2280_v16, 0.0  ;;  %v2281_v17 = vadd.f32 %v2271_v61, %v890_v15  ;;  %v2276_v27 = vadd.f32 %v2275_v0, %v2195_v62 }
 0x375   : > { %v2277_v32 = vpop.f32.mrf.mxu1 }
 0x376   : > { %2288 = vst [vmem:[%s298_s25] sm:$0xff] %v2284_v8  ;;  %v2285_v6 = vmax.f32 %v2281_v17, 0.0  ;;  %v2282_v11 = vadd.f32 %v2276_v27, %v895_v52  ;;  %v2278_v54 = vadd.f32 %v2277_v32, %v2197_v2 }
 0x378   : > { %2289 = vst [vmem:[%s298_s25 + $0x8] sm:$0xff] %v2285_v6  ;;  %v2286_v5 = vmax.f32 %v2282_v11, 0.0  ;;  %v2283_v14 = vadd.f32 %v2278_v54, %v897_v38 }
 0x37a   : > { %2290 = vst [vmem:[%s298_s25 + $0x10] sm:$0xff] %v2286_v5  ;;  %v2287_v22 = vmax.f32 %v2283_v14, 0.0 }
 0x37c   : > { %2291 = vst [vmem:[%s298_s25 + $0x18] sm:$0xff] %v2287_v22 }
 0x37d   : > { %2456 = shalt.err (!%p2453_p3)
}
 0x37e   : > { %s2457_s22 = scalar_lea.hbm %s3030_s17, 512  ;;  %s2461_s10 = scalar_lea.hbm %s3083_s8, 1024 }
 0x37f   : > { %p2458_p4 = scmp.ne.s32.totalorder %s3030_s17, %s2457_s22  ;;  %p2462_p9 = scmp.lt.s32.totalorder %s3030_s17, %s3083_s8 }
 0x380   : > { %p2463_p10 = scmp.lt.s32.totalorder %s2461_s10, %s2457_s22 }
 0x381   : > { %p2459_p7 = pnand %p2458_p4, %p2600_p5 }
 0x382   : > { %p2464_p11 = por %p2463_p10, %p2462_p9 }
 0x383   : > { %p2460_p8 = pneg %p2459_p7 }
 0x385   : > { %p2465_p12 = pnand %p2464_p11, %p2460_p8 }
 0x387   : > { %2468 = shalt.err (!%p2465_p12)
}
 0x388   : > { %s2516_s9 = smov 256  }
 0x389   : > { %2390 = dma.vmem_to_hbm [thread:$0]  (%p2600_p5), %s3025_s26, 512, %s3030_s17, %s3034_s18, %s2516_s9, %s2516_s9, %s2512_s24  }
 0x38a PF: > { %p2396_p13 = scmp.ge.s32.totalorder %s2503_s30, 2  ;;  %s2321_s19 = sand.u32 1, %s2491_s27  }
 0x38b   : > { %s2322_s20 = scalar_lea.sflag [#allocation4], %s2321_s19 }
 0x38c   : > { %p2393_p0 = pnand %p2396_p13, %p2604_p6 }
 0x38e   : > { %p2394_p1 = pneg %p2393_p0 }
 0x390   : > { %2486 = dma.done.wait (%p2394_p1), %s2322_s20, 512  }
 0x391   : > { %2488 = vsyncadd (%p2394_p1), %s2322_s20, 4294966784  ;;  %p18_p2 = scmp.ge.s32.totalorder %s2587_s11, 4   ;;  %s3094_s27 = smov %s2495_s28 }
 0x392   : > { %s3095_s28 = smov %s2499_s29  ;;  %s3096_s29 = smov %s2598_s14 }
 0x393   : > { %s3097_s30 = smov %s2587_s11  ;;  %20 = sbr.rel (!%p18_p2) target bundleno = 3 (0x3), region = 95 }
 0x398   :  { %2327 = vsyncpa [#allocation4], 1 }
 0x399   :  { %2329 = vsyncpa [#allocation4 + $0x1], 1 }

</bundles_post_ra>
